<compile_context>
chip_gen: v7x
topology: tpu7x:2x2x1
jax: 0.10.0
libtpu: 0.0.40
codegen_flags: <defaults>
</compile_context>

<pallas_src>
import functools

import jax
import jax.numpy as jnp
from jax.experimental import pallas as pl
from jax.experimental.pallas import tpu as pltpu


def _deup_cat_kernel(x_ref, prev_ref, wf_ref, w3bd_ref, bf_ref, out_ref):
    # x_ref:    (ts, Cin)          input voxels, channels-last
    # prev_ref: (ts, 8*Cout)       skip connection, lane-dense over (p, c)
    # wf_ref:   (Cin, 8*Cout)      fused conv1*conv2*conv3_y weight
    # w3bd_ref: (8*Cout, 8*Cout)   block-diagonal conv3_prev weight (kron(I_8, w3p))
    # bf_ref:   (1, 8*Cout)        fused bias
    # out_ref:  (ts, 8*Cout)
    acc = jnp.dot(x_ref[...], wf_ref[...], preferred_element_type=jnp.float32)
    acc = acc + jnp.dot(prev_ref[...], w3bd_ref[...],
                        preferred_element_type=jnp.float32)
    out_ref[...] = (acc + bf_ref[...]).astype(out_ref.dtype)


def deup_cat_forward(x, prev, params, *, ts=512):
    """x: (B, Cin, D, H, W); prev: (B, Cout, 2D, 2H, 2W). Returns (B, Cout, 2D, 2H, 2W)."""
    w1, b1, w2, b2, w3, b3 = (params[k] for k in ("w1", "b1", "w2", "b2", "w3", "b3"))
    B, Cin, D, H, W = x.shape
    Cout = w1.shape[0]
    C8 = 8 * Cout
    S = B * D * H * W

    # ---------------- weight pre-fusion (once, in the wrapper) ----------------
    w1t = w1.reshape(Cout, Cin).T                                  # (Cin, Cout)
    w2r = jnp.transpose(w2.reshape(Cout, Cout, 8), (2, 0, 1))      # (8, c_in, c_out) per cell p
    w3_2d = w3.reshape(Cout, 2 * Cout)
    w3pt = w3_2d[:, :Cout].T                                       # (Cout, Cout)  prev half
    w3yt = w3_2d[:, Cout:].T                                       # (Cout, Cout)  upsampled half

    # fused x-path weight: W[c_in, p*Cout + o] = (w1t @ w2r[p] @ w3yt)[c_in, o]
    w_fused = jnp.einsum('ic,pcd,do->pio', w1t, w2r, w3yt)         # (8, Cin, Cout)
    w_fused = jnp.transpose(w_fused, (1, 0, 2)).reshape(Cin, C8)   # (Cin, 8*Cout)

    # fused bias: b[p*Cout + o] = ((b1 @ w2r[p]) + b2) @ w3yt + b3
    b_fused = (jnp.einsum('c,pcd->pd', b1, w2r) + b2[None, :]) @ w3yt + b3[None, :]
    b_fused = b_fused.reshape(1, C8)                               # (1, 8*Cout)

    # block-diagonal prev-path weight (same w3pt for every cell position)
    w3_bd = jnp.kron(jnp.eye(8, dtype=w3pt.dtype), w3pt)           # (8*Cout, 8*Cout)

    # ---------------- activation layout (single rearrange each way) ----------------
    x_flat = jnp.transpose(x, (0, 2, 3, 4, 1)).reshape(S, Cin)
    prev_r = prev.reshape(B, Cout, D, 2, H, 2, W, 2)
    prev_r = jnp.transpose(prev_r, (0, 2, 4, 6, 3, 5, 7, 1)).reshape(S, C8)

    # Tile size: clamp for tiny inputs (avoid gross padding), keep a sublane multiple.
    ts = max(8, min(ts, ((S + 7) // 8) * 8))
    ts = (ts // 8) * 8
    n_blocks = pl.cdiv(S, ts)
    S_pad = n_blocks * ts
    if S_pad != S:
        x_flat = jnp.pad(x_flat, ((0, S_pad - S), (0, 0)))
        prev_r = jnp.pad(prev_r, ((0, S_pad - S), (0, 0)))

    flops = 2 * S_pad * (Cin * C8 + C8 * C8)
    bytes_accessed = 4 * (S_pad * Cin + 2 * S_pad * C8 + Cin * C8 + C8 * C8 + C8)

    out = pl.pallas_call(
        _deup_cat_kernel,
        out_shape=jax.ShapeDtypeStruct((S_pad, C8), jnp.float32),
        grid=(n_blocks,),
        in_specs=[
            pl.BlockSpec((ts, Cin), lambda i: (i, 0)),
            pl.BlockSpec((ts, C8), lambda i: (i, 0)),
            pl.BlockSpec((Cin, C8), lambda i: (0, 0)),   # resident across grid
            pl.BlockSpec((C8, C8), lambda i: (0, 0)),    # resident across grid
            pl.BlockSpec((1, C8), lambda i: (0, 0)),     # resident across grid
        ],
        out_specs=pl.BlockSpec((ts, C8), lambda i: (i, 0)),
        compiler_params=pltpu.CompilerParams(dimension_semantics=("parallel",)),
        cost_estimate=pl.CostEstimate(flops=flops, transcendentals=0,
                                      bytes_accessed=bytes_accessed),
    )(x_flat, prev_r, w_fused, w3_bd, b_fused)

    # ---------------- back to NCDHW ----------------
    out = out[:S, :].reshape(B, D, H, W, 2, 2, 2, Cout)
    out = jnp.transpose(out, (0, 7, 1, 4, 2, 5, 3, 6))             # (B, Cout, D,2, H,2, W,2)
    return out.reshape(B, Cout, 2 * D, 2 * H, 2 * W)


def reference_forward(x, prev, params):
    """Plain-JAX reference mirroring the PyTorch module semantics (NCDHW)."""
    w1, b1, w2, b2, w3, b3 = (params[k] for k in ("w1", "b1", "w2", "b2", "w3", "b3"))
    Cout = w1.shape[0]
    x1 = jnp.einsum('bcdhw,oc->bodhw', x, w1.reshape(Cout, -1)) + b1[None, :, None, None, None]
    t = jnp.einsum('bcdhw,coijk->bodihjwk', x1, w2)
    B, Co, D, _, H, _, W, _ = t.shape
    y = t.reshape(B, Co, 2 * D, 2 * H, 2 * W) + b2[None, :, None, None, None]
    z = jnp.concatenate([prev, y], axis=1)
    y3 = jnp.einsum('bcdhw,oc->bodhw', z, w3.reshape(Cout, -1)) + b3[None, :, None, None, None]
    return y3


def init_params(key, in_channels, out_channels):
    ks = jax.random.split(key, 6)
    scale = 0.1
    return {
        # conv1: Conv3d(in, out, k=1) -> weight (out, in, 1, 1, 1)
        "w1": scale * jax.random.normal(ks[0], (out_channels, in_channels, 1, 1, 1), jnp.float32),
        "b1": scale * jax.random.normal(ks[1], (out_channels,), jnp.float32),
        # conv2: ConvTranspose3d(out, out, k=2, s=2) -> weight (in=out, out, 2, 2, 2)
        "w2": scale * jax.random.normal(ks[2], (out_channels, out_channels, 2, 2, 2), jnp.float32),
        "b2": scale * jax.random.normal(ks[3], (out_channels,), jnp.float32),
        # conv3: Conv3d(2*out, out, k=1) -> weight (out, 2*out, 1, 1, 1)
        "w3": scale * jax.random.normal(ks[4], (out_channels, 2 * out_channels, 1, 1, 1), jnp.float32),
        "b3": scale * jax.random.normal(ks[5], (out_channels,), jnp.float32),
    }


if __name__ == "__main__":
    key = jax.random.PRNGKey(0)
    k_x, k_prev, k_p = jax.random.split(key, 3)

    # Cout=16 -> 8*Cout = 128 (exactly one lane width); S = 2*8*8*8 = 1024 -> 2 grid steps at ts=512.
    B, Cin, Cout = 2, 8, 16
    D = H = W = 8
    x = jax.random.normal(k_x, (B, Cin, D, H, W), jnp.float32)
    prev = jax.random.normal(k_prev, (B, Cout, 2 * D, 2 * H, 2 * W), jnp.float32)
    params = init_params(k_p, Cin, Cout)

    fwd = jax.jit(functools.partial(deup_cat_forward, ts=512))
    out = jax.block_until_ready(fwd(x, prev, params))

    ref = reference_forward(x, prev, params)
    assert out.shape == ref.shape == (B, Cout, 2 * D, 2 * H, 2 * W)
    assert jnp.allclose(out, ref, atol=1e-4, rtol=1e-4), float(jnp.max(jnp.abs(out - ref)))

    print("KERNEL_OK")
</pallas_src>

<mosaic_0001>
module attributes {stable_mosaic.version = 11 : i64} {
  func.func @_deup_cat_kernel(%arg0: i32, %arg1: memref<512x8xf32, #tpu.memory_space<vmem>>, %arg2: memref<512x128xf32, #tpu.memory_space<vmem>>, %arg3: memref<8x128xf32, #tpu.memory_space<vmem>>, %arg4: memref<128x128xf32, #tpu.memory_space<vmem>>, %arg5: memref<1x128xf32, #tpu.memory_space<vmem>>, %arg6: memref<512x128xf32, #tpu.memory_space<vmem>>) attributes {dimension_semantics = [#tpu.dimension_semantics<parallel>], iteration_bounds = array<i64: 2>, scalar_prefetch = 0 : i64, scratch_operands = 0 : i64, tpu.core_type = #tpu.core_type<tc>, window_params = [{transform_indices = @transform_0, window_bounds = array<i64: 512, 8>}, {transform_indices = @transform_1, window_bounds = array<i64: 512, 128>}, {pipeline_mode = #tpu.pipeline_mode<synchronous>, transform_indices = @transform_2, window_bounds = array<i64: 8, 128>}, {pipeline_mode = #tpu.pipeline_mode<synchronous>, transform_indices = @transform_3, window_bounds = array<i64: 128, 128>}, {pipeline_mode = #tpu.pipeline_mode<synchronous>, transform_indices = @transform_4, window_bounds = array<i64: 1, 128>}, {transform_indices = @transform_5, window_bounds = array<i64: 512, 128>}]} {
    %c0 = arith.constant 0 : index
    %c0_0 = arith.constant 0 : index
    %0 = vector.load %arg1[%c0, %c0_0] : memref<512x8xf32, #tpu.memory_space<vmem>>, vector<512x8xf32>
    %c0_1 = arith.constant 0 : index
    %c0_2 = arith.constant 0 : index
    %1 = vector.load %arg3[%c0_1, %c0_2] : memref<8x128xf32, #tpu.memory_space<vmem>>, vector<8x128xf32>
    %cst = arith.constant dense<0.000000e+00> : vector<512x128xf32>
    %2 = tpu.matmul %0, %1, %cst {dimension_numbers = #tpu.dot_dimension_numbers<[1], [0], [0], [1], [0, 0, 1, 1], [], []>} : vector<512x8xf32>, vector<8x128xf32>, vector<512x128xf32> -> vector<512x128xf32>
    %c0_3 = arith.constant 0 : index
    %c0_4 = arith.constant 0 : index
    %3 = vector.load %arg2[%c0_3, %c0_4] : memref<512x128xf32, #tpu.memory_space<vmem>>, vector<512x128xf32>
    %c0_5 = arith.constant 0 : index
    %c0_6 = arith.constant 0 : index
    %4 = vector.load %arg4[%c0_5, %c0_6] : memref<128x128xf32, #tpu.memory_space<vmem>>, vector<128x128xf32>
    %cst_7 = arith.constant dense<0.000000e+00> : vector<512x128xf32>
    %5 = tpu.matmul %3, %4, %cst_7 {dimension_numbers = #tpu.dot_dimension_numbers<[1], [0], [0], [1], [0, 0, 1, 1], [], []>} : vector<512x128xf32>, vector<128x128xf32>, vector<512x128xf32> -> vector<512x128xf32>
    %6 = arith.addf %2, %5 : vector<512x128xf32>
    %c0_8 = arith.constant 0 : index
    %c0_9 = arith.constant 0 : index
    %7 = vector.load %arg5[%c0_8, %c0_9] : memref<1x128xf32, #tpu.memory_space<vmem>>, vector<1x128xf32>
    %8 = vector.broadcast %7 : vector<1x128xf32> to vector<512x128xf32>
    %9 = arith.addf %6, %8 : vector<512x128xf32>
    %c0_10 = arith.constant 0 : index
    %c0_11 = arith.constant 0 : index
    %10 = vector.load %arg6[%c0_10, %c0_11] : memref<512x128xf32, #tpu.memory_space<vmem>>, vector<512x128xf32>
    tpu.vector_store %arg6[%c0_10, %c0_11], %9 {strides = array<i32>} : memref<512x128xf32, #tpu.memory_space<vmem>>, vector<512x128xf32>,
    return
  }
  func.func @transform_0(%arg0: i32) -> (i32, i32) {
    %c0_i32 = arith.constant 0 : i32
    %c0_i32_0 = arith.constant 0 : i32
    return %arg0, %c0_i32 : i32, i32
  }
  func.func @transform_1(%arg0: i32) -> (i32, i32) {
    %c0_i32 = arith.constant 0 : i32
    %c0_i32_0 = arith.constant 0 : i32
    return %arg0, %c0_i32 : i32, i32
  }
  func.func @transform_2(%arg0: i32) -> (i32, i32) {
    %c0_i32 = arith.constant 0 : i32
    %c0_i32_0 = arith.constant 0 : i32
    %c0_i32_1 = arith.constant 0 : i32
    return %c0_i32, %c0_i32_0 : i32, i32
  }
  func.func @transform_3(%arg0: i32) -> (i32, i32) {
    %c0_i32 = arith.constant 0 : i32
    %c0_i32_0 = arith.constant 0 : i32
    %c0_i32_1 = arith.constant 0 : i32
    return %c0_i32, %c0_i32_0 : i32, i32
  }
  func.func @transform_4(%arg0: i32) -> (i32, i32) {
    %c0_i32 = arith.constant 0 : i32
    %c0_i32_0 = arith.constant 0 : i32
    %c0_i32_1 = arith.constant 0 : i32
    return %c0_i32, %c0_i32_0 : i32, i32
  }
  func.func @transform_5(%arg0: i32) -> (i32, i32) {
    %c0_i32 = arith.constant 0 : i32
    %c0_i32_0 = arith.constant 0 : i32
    return %arg0, %c0_i32 : i32, i32
  }
}

</mosaic_0001>

<bundles_post_ra>
// kernel: deup_cat_forward.1
= control target key start
LH: loop header
LB: loop body
LE: loop exit
PB: predicated region body
PF: predicated region fallthrough
CT: control target
= control target key end

     0   :  { %s2152_s18 = smov 0   ;;  %s2685_s0 = inlined_call_operand.vmem [shape: f32[1024,8], index: 0, kind: input, shape index: {}]   ;;  %s2686_s1 = inlined_call_operand.vmem [shape: f32[1024,128], index: 1, kind: input, shape index: {}]   ;;  %s2687_s2 = inlined_call_operand.vmem [shape: f32[8,128], index: 2, kind: input, shape index: {}]   ;;  %s2688_s3 = inlined_call_operand.vmem [shape: f32[128,128], index: 3, kind: input, shape index: {}]   ;;  %s2689_s4 = inlined_call_operand.vmem [shape: f32[1,128], index: 4, kind: input, shape index: {}]   ;;  %s2690_s5 = inlined_call_operand.vmem [shape: f32[1024,128], index: 5, kind: output, shape index: {}]  }
   0x1 LB: > { %s1561_s19 = sadd.s32 4294967295, %s2120_s18   ;;  %p1565_p0 = scmp.ge.s32.totalorder %s2120_s18, 1  ;;  %s2120_s18 = sphi %s2152_s18, %s15_s18  }
   0x2   : > { %p199_p1 = scmp.lt.s32.totalorder %s2120_s18, 3 }
   0x4   : > { %p200_p2 = pnand %p1565_p0, %p199_p1 }
   0x5   : > { %v379_v0 = vld [vmem:[%s2688_s3] sm:$0xff] (!%p200_p2)  ;;  %v380_v1 = vld [vmem:[%s2688_s3 + $0x8] sm:$0xff] (!%p200_p2)  ;;  %v381_v2 = vld [vmem:[%s2688_s3 + $0x10] sm:$0xff] (!%p200_p2)  ;;  %s1566_s26 = sshll.u32 (!%p200_p2), %s1561_s19, 6  ;;  %vm780_vm0 = vcmask (!%p200_p2), 64512  }
   0x6   : > { %203 = sbr.rel (%p200_p2) target bundleno = 382 (0x17e), region = 40  ;;  %v2010_v3 = vpack.c.bf16 (!%p200_p2), %v380_v1, %v379_v0  ;;  %v382_v4 = vld [vmem:[%s2688_s3 + $0x18] sm:$0xff] (!%p200_p2)  ;;  %p233_p3 = scmp.lt.s32.totalorder (!%p200_p2), %s1566_s26, 127  ;;  %v383_v6 = vld [vmem:[%s2688_s3 + $0x20] sm:$0xff] (!%p200_p2)  ;;  %v384_v7 = vld [vmem:[%s2688_s3 + $0x28] sm:$0xff] (!%p200_p2) }
   0x7   : > { %v2014_v5 = vpack.c.bf16 (!%p200_p2), %v382_v4, %v381_v2  ;;  %v2018_v8 = vpack.c.bf16 (!%p200_p2), %v384_v7, %v383_v6  ;;  %v314_v9 = vld [vmem:[%s2687_s2] sm:$0xff] (!%p200_p2)  ;;  %v385_v10 = vld [vmem:[%s2688_s3 + $0x30] sm:$0xff] (!%p200_p2)  ;;  %v386_v11 = vld [vmem:[%s2688_s3 + $0x38] sm:$0xff] (!%p200_p2) }
   0x8   : > { %2011 = vmatprep.subr.bf16.mxu1 (!%p200_p2), %v2010_v3  ;;  %1912 = vmatprep.subr.mxu0 (!%p200_p2), %v314_v9  ;;  %v2022_v16 = vpack.c.bf16 (!%p200_p2), %v386_v11, %v385_v10  ;;  %v387_v17 = vld [vmem:[%s2688_s3 + $0x40] sm:$0xff] (!%p200_p2)  ;;  %v388_v18 = vld [vmem:[%s2688_s3 + $0x48] sm:$0xff] (!%p200_p2)  ;;  %v389_v22 = vld [vmem:[%s2688_s3 + $0x50] sm:$0xff] (!%p200_p2) }
   0x9   : > { %2013 = vmatpush3.bf16.msra.mxu1 (!%p200_p2), %v2010_v3  ;;  %1913 = vmatpush3.msra.mxu0 (!%p200_p2), %v314_v9  ;;  %v2026_v21 = vpack.c.bf16 (!%p200_p2), %v388_v18, %v387_v17  ;;  %v390_v23 = vld [vmem:[%s2688_s3 + $0x58] sm:$0xff] (!%p200_p2)  ;;  %v391_v27 = vld [vmem:[%s2688_s3 + $0x60] sm:$0xff] (!%p200_p2)  ;;  %v392_v28 = vld [vmem:[%s2688_s3 + $0x68] sm:$0xff] (!%p200_p2) }
   0xa   : > { %2015 = vmatprep.subr.bf16.mxu1 (!%p200_p2), %v2014_v5  ;;  %v2030_v26 = vpack.c.bf16 (!%p200_p2), %v390_v23, %v389_v22  ;;  %v2034_v31 = vpack.c.bf16 (!%p200_p2), %v392_v28, %v391_v27  ;;  %v393_v32 = vld [vmem:[%s2688_s3 + $0x70] sm:$0xff] (!%p200_p2)  ;;  %v394_v33 = vld [vmem:[%s2688_s3 + $0x78] sm:$0xff] (!%p200_p2) }
   0xb   : > { %v2038_v36 = vpack.c.bf16 (!%p200_p2), %v394_v33, %v393_v32 }
   0xd   : > { %s2692_s26 = smov (!%p233_p3, %s1566_s26), 127  ;;  %2017 = vmatpush3.bf16.msra.mxu1 %v2014_v5 }
   0xe   : > { %s2181_s10 = sshll.u32 %s2692_s26, 3  ;;  %2019 = vmatprep.subr.bf16.mxu1 %v2018_v8 }
   0xf   : > { %s2193_s17 = scalar_lea.vmem %s2685_s0, %s2181_s10  ;;  %s2199_s21 = scalar_lea.vmem %s2686_s1, %s2181_s10 }
  0x10   : > { %v250_v12 = vld [vmem:[%s2193_s17] sm:$0xff]  ;;  %v251_v14 = vld [vmem:[%s2193_s17 + $0x8] sm:$0xff]  ;;  %v252_v15 = vld [vmem:[%s2193_s17 + $0x10] sm:$0xff]  ;;  %s2430_s19 = scalar_lea.vmem %s2690_s5, %s2181_s10 }
  0x11   : > { %v315_v13 = vld [vmem:[%s2199_s21] sm:$0xff]  ;;  %1914 = vmatprep.mubr.msk.f32.mxu0 %vm780_vm0, %v250_v12  ;;  %v253_v19 = vld [vmem:[%s2193_s17 + $0x18] sm:$0xff]  ;;  %2021 = vmatpush3.bf16.msra.mxu1 %v2018_v8  ;;  %v255_v24 = vld [vmem:[%s2193_s17 + $0x28] sm:$0xff] }
  0x12   : > { %1816 = vmatprep.mubr.f32.mxu1 %v315_v13  ;;  %1915 = vmatmul.mubr.msk.f32.vlgmr.msra.gmra.mrb[0].mxu0 %vm780_vm0, %v251_v14  ;;  %v254_v20 = vld [vmem:[%s2193_s17 + $0x20] sm:$0xff]  ;;  %v256_v25 = vld [vmem:[%s2193_s17 + $0x30] sm:$0xff]  ;;  %v257_v29 = vld [vmem:[%s2193_s17 + $0x38] sm:$0xff] }
  0x13   : > { %1917 = vmatprep.mubr.msk.f32.mxu0 %vm780_vm0, %v252_v15  ;;  %2023 = vmatprep.subr.bf16.mxu1 %v2022_v16  ;;  %v258_v30 = vld [vmem:[%s2193_s17 + $0x40] sm:$0xff]  ;;  %v259_v34 = vld [vmem:[%s2193_s17 + $0x48] sm:$0xff]  ;;  %v260_v35 = vld [vmem:[%s2193_s17 + $0x50] sm:$0xff] }
  0x14   : > { %v261_v37 = vld [vmem:[%s2193_s17 + $0x58] sm:$0xff]  ;;  %v262_v38 = vld [vmem:[%s2193_s17 + $0x60] sm:$0xff]  ;;  %v263_v39 = vld [vmem:[%s2193_s17 + $0x68] sm:$0xff] }
  0x15   : > { %2025 = vmatpush3.bf16.msra.mxu1 %v2022_v16  ;;  %v316_v40 = vld [vmem:[%s2199_s21 + $0x8] sm:$0xff]  ;;  %v264_v41 = vld [vmem:[%s2193_s17 + $0x70] sm:$0xff]  ;;  %v265_v43 = vld [vmem:[%s2193_s17 + $0x78] sm:$0xff] }
  0x16   : > { %1918 = vmatmul.mubr.msk.f32.gmra.mrb[2].mxu0 %vm780_vm0, %v253_v19  ;;  %2027 = vmatprep.subr.bf16.mxu1 %v2026_v21  ;;  %v317_v42 = vld [vmem:[%s2199_s21 + $0x10] sm:$0xff]  ;;  %v318_v44 = vld [vmem:[%s2199_s21 + $0x18] sm:$0xff]  ;;  %v266_v45 = vld [vmem:[%s2193_s17 + $0x80] sm:$0xff] }
  0x17   : > { %1920 = vmatprep.mubr.msk.f32.mxu0 %vm780_vm0, %v254_v20  ;;  %v319_v46 = vld [vmem:[%s2199_s21 + $0x20] sm:$0xff]  ;;  %v267_v47 = vld [vmem:[%s2193_s17 + $0x88] sm:$0xff]  ;;  %v268_v49 = vld [vmem:[%s2193_s17 + $0x90] sm:$0xff] }
  0x18   : > { %v320_v48 = vld [vmem:[%s2199_s21 + $0x28] sm:$0xff]  ;;  %v321_v50 = vld [vmem:[%s2199_s21 + $0x30] sm:$0xff]  ;;  %v269_v51 = vld [vmem:[%s2193_s17 + $0x98] sm:$0xff] }
  0x19   : > { %2029 = vmatpush3.bf16.msra.mxu1 %v2026_v21  ;;  %v322_v52 = vld [vmem:[%s2199_s21 + $0x38] sm:$0xff]  ;;  %v270_v53 = vld [vmem:[%s2193_s17 + $0xa0] sm:$0xff]  ;;  %v271_v55 = vld [vmem:[%s2193_s17 + $0xa8] sm:$0xff] }
  0x1a   : > { %1921 = vmatmul.mubr.msk.f32.gmra.mrb[4].mxu0 %vm780_vm0, %v255_v24  ;;  %2031 = vmatprep.subr.bf16.mxu1 %v2030_v26  ;;  %v323_v54 = vld [vmem:[%s2199_s21 + $0x40] sm:$0xff]  ;;  %v324_v56 = vld [vmem:[%s2199_s21 + $0x48] sm:$0xff]  ;;  %v272_v57 = vld [vmem:[%s2193_s17 + $0xb0] sm:$0xff] }
  0x1b   : > { %1923 = vmatprep.mubr.msk.f32.mxu0 %vm780_vm0, %v256_v25  ;;  %v325_v58 = vld [vmem:[%s2199_s21 + $0x50] sm:$0xff]  ;;  %v273_v59 = vld [vmem:[%s2193_s17 + $0xb8] sm:$0xff]  ;;  %v274_v61 = vld [vmem:[%s2193_s17 + $0xc0] sm:$0xff] }
  0x1c   : > { %v326_v60 = vld [vmem:[%s2199_s21 + $0x58] sm:$0xff]  ;;  %v327_v62 = vld [vmem:[%s2199_s21 + $0x60] sm:$0xff]  ;;  %v275_v63 = vld [vmem:[%s2193_s17 + $0xc8] sm:$0xff] }
  0x1d   : > { %2033 = vmatpush3.bf16.msra.mxu1 %v2030_v26  ;;  %v328_v0 = vld [vmem:[%s2199_s21 + $0x68] sm:$0xff]  ;;  %v276_v1 = vld [vmem:[%s2193_s17 + $0xd0] sm:$0xff]  ;;  %v277_v3 = vld [vmem:[%s2193_s17 + $0xd8] sm:$0xff] }
  0x1e   : > { %1924 = vmatmul.mubr.msk.f32.gmra.mrb[6].mxu0 %vm780_vm0, %v257_v29  ;;  %2035 = vmatprep.subr.bf16.mxu1 %v2034_v31  ;;  %v329_v2 = vld [vmem:[%s2199_s21 + $0x70] sm:$0xff]  ;;  %v330_v4 = vld [vmem:[%s2199_s21 + $0x78] sm:$0xff]  ;;  %v278_v5 = vld [vmem:[%s2193_s17 + $0xe0] sm:$0xff] }
  0x1f   : > { %1926 = vmatprep.mubr.msk.f32.mxu0 %vm780_vm0, %v258_v30  ;;  %v331_v6 = vld [vmem:[%s2199_s21 + $0x80] sm:$0xff]  ;;  %v279_v7 = vld [vmem:[%s2193_s17 + $0xe8] sm:$0xff]  ;;  %v280_v9 = vld [vmem:[%s2193_s17 + $0xf0] sm:$0xff] }
  0x20   : > { %v332_v8 = vld [vmem:[%s2199_s21 + $0x88] sm:$0xff]  ;;  %v333_v10 = vld [vmem:[%s2199_s21 + $0x90] sm:$0xff]  ;;  %v281_v11 = vld [vmem:[%s2193_s17 + $0xf8] sm:$0xff] }
  0x21   : > { %2037 = vmatpush3.bf16.msra.mxu1 %v2034_v31  ;;  %v334_v12 = vld [vmem:[%s2199_s21 + $0x98] sm:$0xff]  ;;  %v282_v13 = vld [vmem:[%s2193_s17 + $0x100] sm:$0xff]  ;;  %v283_v15 = vld [vmem:[%s2193_s17 + $0x108] sm:$0xff] }
  0x22   : > { %1927 = vmatmul.mubr.msk.f32.gmra.mrb[8].mxu0 %vm780_vm0, %v259_v34  ;;  %2039 = vmatprep.subr.bf16.mxu1 %v2038_v36  ;;  %v335_v14 = vld [vmem:[%s2199_s21 + $0xa0] sm:$0xff]  ;;  %v336_v16 = vld [vmem:[%s2199_s21 + $0xa8] sm:$0xff]  ;;  %v284_v17 = vld [vmem:[%s2193_s17 + $0x110] sm:$0xff] }
  0x23   : > { %1929 = vmatprep.mubr.msk.f32.mxu0 %vm780_vm0, %v260_v35  ;;  %v337_v18 = vld [vmem:[%s2199_s21 + $0xb0] sm:$0xff]  ;;  %v285_v19 = vld [vmem:[%s2193_s17 + $0x118] sm:$0xff]  ;;  %v286_v21 = vld [vmem:[%s2193_s17 + $0x120] sm:$0xff] }
  0x24   : > { %v338_v20 = vld [vmem:[%s2199_s21 + $0xb8] sm:$0xff]  ;;  %v339_v22 = vld [vmem:[%s2199_s21 + $0xc0] sm:$0xff]  ;;  %v287_v23 = vld [vmem:[%s2193_s17 + $0x128] sm:$0xff] }
  0x25   : > { %2041 = vmatpush3.bf16.msra.mxu1 %v2038_v36  ;;  %v340_v24 = vld [vmem:[%s2199_s21 + $0xc8] sm:$0xff]  ;;  %v288_v25 = vld [vmem:[%s2193_s17 + $0x130] sm:$0xff]  ;;  %v289_v27 = vld [vmem:[%s2193_s17 + $0x138] sm:$0xff] }
  0x26   : > { %1930 = vmatmul.mubr.msk.f32.gmra.mrb[10].mxu0 %vm780_vm0, %v261_v37  ;;  %v341_v26 = vld [vmem:[%s2199_s21 + $0xd0] sm:$0xff]  ;;  %v342_v28 = vld [vmem:[%s2199_s21 + $0xd8] sm:$0xff]  ;;  %v290_v29 = vld [vmem:[%s2193_s17 + $0x140] sm:$0xff] }
  0x27   : > { %1932 = vmatprep.mubr.msk.f32.mxu0 %vm780_vm0, %v262_v38  ;;  %v343_v30 = vld [vmem:[%s2199_s21 + $0xe0] sm:$0xff]  ;;  %v291_v31 = vld [vmem:[%s2193_s17 + $0x148] sm:$0xff]  ;;  %v292_v33 = vld [vmem:[%s2193_s17 + $0x150] sm:$0xff] }
  0x28   : > { %1817 = vmatmul.mubr.f32.vlgmr.msra.gmra.mrb[0].mxu1 %v316_v40  ;;  %v344_v32 = vld [vmem:[%s2199_s21 + $0xe8] sm:$0xff]  ;;  %v345_v34 = vld [vmem:[%s2199_s21 + $0xf0] sm:$0xff]  ;;  %v293_v35 = vld [vmem:[%s2193_s17 + $0x158] sm:$0xff] }
  0x29   : > { %1819 = vmatprep.mubr.f32.mxu1 %v317_v42  ;;  %v346_v36 = vld [vmem:[%s2199_s21 + $0xf8] sm:$0xff]  ;;  %v294_v37 = vld [vmem:[%s2193_s17 + $0x160] sm:$0xff]  ;;  %v348_v40 = vld [vmem:[%s2199_s21 + $0x108] sm:$0xff] }
  0x2a   : > { %1933 = vmatmul.mubr.msk.f32.gmra.mrb[12].mxu0 %vm780_vm0, %v263_v39  ;;  %v347_v38 = vld [vmem:[%s2199_s21 + $0x100] sm:$0xff]  ;;  %v295_v39 = vld [vmem:[%s2193_s17 + $0x168] sm:$0xff]  ;;  %v349_v42 = vld [vmem:[%s2199_s21 + $0x110] sm:$0xff] }
  0x2b   : > { %1935 = vmatprep.mubr.msk.f32.mxu0 %vm780_vm0, %v264_v41  ;;  %v296_v41 = vld [vmem:[%s2193_s17 + $0x170] sm:$0xff] }
  0x2c   : > { %1820 = vmatmul.mubr.f32.gmra.mrb[2].mxu1 %v318_v44  ;;  %v350_v44 = vld [vmem:[%s2199_s21 + $0x118] sm:$0xff] }
  0x2d   : > { %1822 = vmatprep.mubr.f32.mxu1 %v319_v46  ;;  %v351_v46 = vld [vmem:[%s2199_s21 + $0x120] sm:$0xff] }
  0x2e   : > { %1936 = vmatmul.mubr.msk.f32.gmra.mrb[14].mxu0 %vm780_vm0, %v265_v43  ;;  %v297_v43 = vld [vmem:[%s2193_s17 + $0x178] sm:$0xff] }
  0x2f   : > { %1938 = vmatprep.mubr.msk.f32.mxu0 %vm780_vm0, %v266_v45  ;;  %v298_v45 = vld [vmem:[%s2193_s17 + $0x180] sm:$0xff] }
  0x30   : > { %1823 = vmatmul.mubr.f32.gmra.mrb[4].mxu1 %v320_v48  ;;  %v352_v48 = vld [vmem:[%s2199_s21 + $0x128] sm:$0xff] }
  0x31   : > { %1825 = vmatprep.mubr.f32.mxu1 %v321_v50  ;;  %v353_v50 = vld [vmem:[%s2199_s21 + $0x130] sm:$0xff] }
  0x32   : > { %1939 = vmatmul.mubr.msk.f32.gmra.mrb[16].mxu0 %vm780_vm0, %v267_v47  ;;  %v299_v47 = vld [vmem:[%s2193_s17 + $0x188] sm:$0xff] }
  0x33   : > { %1941 = vmatprep.mubr.msk.f32.mxu0 %vm780_vm0, %v268_v49  ;;  %v300_v49 = vld [vmem:[%s2193_s17 + $0x190] sm:$0xff] }
  0x34   : > { %1826 = vmatmul.mubr.f32.gmra.mrb[6].mxu1 %v322_v52  ;;  %v354_v52 = vld [vmem:[%s2199_s21 + $0x138] sm:$0xff] }
  0x35   : > { %1828 = vmatprep.mubr.f32.mxu1 %v323_v54  ;;  %v355_v54 = vld [vmem:[%s2199_s21 + $0x140] sm:$0xff] }
  0x36   : > { %1942 = vmatmul.mubr.msk.f32.gmra.mrb[18].mxu0 %vm780_vm0, %v269_v51  ;;  %v301_v51 = vld [vmem:[%s2193_s17 + $0x198] sm:$0xff] }
  0x37   : > { %1944 = vmatprep.mubr.msk.f32.mxu0 %vm780_vm0, %v270_v53  ;;  %v302_v53 = vld [vmem:[%s2193_s17 + $0x1a0] sm:$0xff] }
  0x38   : > { %1829 = vmatmul.mubr.f32.gmra.mrb[8].mxu1 %v324_v56  ;;  %v356_v56 = vld [vmem:[%s2199_s21 + $0x148] sm:$0xff] }
  0x39   : > { %1831 = vmatprep.mubr.f32.mxu1 %v325_v58  ;;  %v357_v58 = vld [vmem:[%s2199_s21 + $0x150] sm:$0xff] }
  0x3a   : > { %1945 = vmatmul.mubr.msk.f32.gmra.mrb[20].mxu0 %vm780_vm0, %v271_v55  ;;  %v303_v55 = vld [vmem:[%s2193_s17 + $0x1a8] sm:$0xff] }
  0x3b   : > { %1947 = vmatprep.mubr.msk.f32.mxu0 %vm780_vm0, %v272_v57  ;;  %v304_v57 = vld [vmem:[%s2193_s17 + $0x1b0] sm:$0xff] }
  0x3c   : > { %1832 = vmatmul.mubr.f32.gmra.mrb[10].mxu1 %v326_v60  ;;  %v358_v60 = vld [vmem:[%s2199_s21 + $0x158] sm:$0xff] }
  0x3d   : > { %1834 = vmatprep.mubr.f32.mxu1 %v327_v62  ;;  %v359_v62 = vld [vmem:[%s2199_s21 + $0x160] sm:$0xff] }
  0x3e   : > { %1948 = vmatmul.mubr.msk.f32.gmra.mrb[22].mxu0 %vm780_vm0, %v273_v59  ;;  %v305_v59 = vld [vmem:[%s2193_s17 + $0x1b8] sm:$0xff] }
  0x3f   : > { %1950 = vmatprep.mubr.msk.f32.mxu0 %vm780_vm0, %v274_v61  ;;  %v306_v61 = vld [vmem:[%s2193_s17 + $0x1c0] sm:$0xff] }
  0x40   : > { %1835 = vmatmul.mubr.f32.gmra.mrb[12].mxu1 %v328_v0  ;;  %v360_v0 = vld [vmem:[%s2199_s21 + $0x168] sm:$0xff] }
  0x41   : > { %1837 = vmatprep.mubr.f32.mxu1 %v329_v2  ;;  %v361_v2 = vld [vmem:[%s2199_s21 + $0x170] sm:$0xff] }
  0x42   : > { %1951 = vmatmul.mubr.msk.f32.gmra.mrb[24].mxu0 %vm780_vm0, %v275_v63  ;;  %v307_v63 = vld [vmem:[%s2193_s17 + $0x1c8] sm:$0xff] }
  0x43   : > { %1953 = vmatprep.mubr.msk.f32.mxu0 %vm780_vm0, %v276_v1  ;;  %v308_v1 = vld [vmem:[%s2193_s17 + $0x1d0] sm:$0xff] }
  0x44   : > { %1838 = vmatmul.mubr.f32.gmra.mrb[14].mxu1 %v330_v4  ;;  %v362_v4 = vld [vmem:[%s2199_s21 + $0x178] sm:$0xff] }
  0x45   : > { %1840 = vmatprep.mubr.f32.mxu1 %v331_v6  ;;  %v363_v6 = vld [vmem:[%s2199_s21 + $0x180] sm:$0xff] }
  0x46   : > { %1954 = vmatmul.mubr.msk.f32.gmra.mrb[26].mxu0 %vm780_vm0, %v277_v3  ;;  %v309_v3 = vld [vmem:[%s2193_s17 + $0x1d8] sm:$0xff] }
  0x47   : > { %1956 = vmatprep.mubr.msk.f32.mxu0 %vm780_vm0, %v278_v5  ;;  %v310_v5 = vld [vmem:[%s2193_s17 + $0x1e0] sm:$0xff] }
  0x48   : > { %1841 = vmatmul.mubr.f32.gmra.mrb[16].mxu1 %v332_v8  ;;  %v364_v8 = vld [vmem:[%s2199_s21 + $0x188] sm:$0xff] }
  0x49   : > { %1843 = vmatprep.mubr.f32.mxu1 %v333_v10  ;;  %v365_v10 = vld [vmem:[%s2199_s21 + $0x190] sm:$0xff] }
  0x4a   : > { %1957 = vmatmul.mubr.msk.f32.gmra.mrb[28].mxu0 %vm780_vm0, %v279_v7  ;;  %v311_v7 = vld [vmem:[%s2193_s17 + $0x1e8] sm:$0xff] }
  0x4b   : > { %1959 = vmatprep.mubr.msk.f32.mxu0 %vm780_vm0, %v280_v9  ;;  %v312_v9 = vld [vmem:[%s2193_s17 + $0x1f0] sm:$0xff] }
  0x4c   : > { %1844 = vmatmul.mubr.f32.gmra.mrb[18].mxu1 %v334_v12  ;;  %v366_v12 = vld [vmem:[%s2199_s21 + $0x198] sm:$0xff] }
  0x4d   : > { %1846 = vmatprep.mubr.f32.mxu1 %v335_v14  ;;  %v368_v14 = vld [vmem:[%s2199_s21 + $0x1a8] sm:$0xff] }
  0x4e   : > { %1960 = vmatmul.mubr.msk.f32.gmra.mrb[30].mxu0 %vm780_vm0, %v281_v11  ;;  %v313_v11 = vld [vmem:[%s2193_s17 + $0x1f8] sm:$0xff] }
  0x4f   : > { %1962 = vmatprep.mubr.msk.f32.mxu0 %vm780_vm0, %v282_v13  ;;  %v367_v13 = vld [vmem:[%s2199_s21 + $0x1a0] sm:$0xff] }
  0x50   : > { %1847 = vmatmul.mubr.f32.gmra.mrb[20].mxu1 %v336_v16  ;;  %v370_v16 = vld [vmem:[%s2199_s21 + $0x1b8] sm:$0xff] }
  0x51   : > { %1849 = vmatprep.mubr.f32.mxu1 %v337_v18  ;;  %v372_v18 = vld [vmem:[%s2199_s21 + $0x1c8] sm:$0xff] }
  0x52   : > { %1963 = vmatmul.mubr.msk.f32.gmra.mrb[32].mxu0 %vm780_vm0, %v283_v15  ;;  %v369_v15 = vld [vmem:[%s2199_s21 + $0x1b0] sm:$0xff] }
  0x53   : > { %1965 = vmatprep.mubr.msk.f32.mxu0 %vm780_vm0, %v284_v17  ;;  %v371_v17 = vld [vmem:[%s2199_s21 + $0x1c0] sm:$0xff] }
  0x54   : > { %1850 = vmatmul.mubr.f32.gmra.mrb[22].mxu1 %v338_v20  ;;  %v374_v20 = vld [vmem:[%s2199_s21 + $0x1d8] sm:$0xff] }
  0x55   : > { %1852 = vmatprep.mubr.f32.mxu1 %v339_v22  ;;  %v376_v22 = vld [vmem:[%s2199_s21 + $0x1e8] sm:$0xff] }
  0x56   : > { %1966 = vmatmul.mubr.msk.f32.gmra.mrb[34].mxu0 %vm780_vm0, %v285_v19  ;;  %v373_v19 = vld [vmem:[%s2199_s21 + $0x1d0] sm:$0xff] }
  0x57   : > { %1968 = vmatprep.mubr.msk.f32.mxu0 %vm780_vm0, %v286_v21  ;;  %v375_v21 = vld [vmem:[%s2199_s21 + $0x1e0] sm:$0xff] }
  0x58   : > { %1853 = vmatmul.mubr.f32.gmra.mrb[24].mxu1 %v340_v24  ;;  %v378_v24 = vld [vmem:[%s2199_s21 + $0x1f8] sm:$0xff] }
  0x59   : > { %1855 = vmatprep.mubr.f32.mxu1 %v341_v26 }
  0x5a   : > { %1969 = vmatmul.mubr.msk.f32.gmra.mrb[36].mxu0 %vm780_vm0, %v287_v23  ;;  %v377_v23 = vld [vmem:[%s2199_s21 + $0x1f0] sm:$0xff] }
  0x5b   : > { %1971 = vmatprep.mubr.msk.f32.mxu0 %vm780_vm0, %v288_v25 }
  0x5c   : > { %1856 = vmatmul.mubr.f32.gmra.mrb[26].mxu1 %v342_v28 }
  0x5d   : > { %1858 = vmatprep.mubr.f32.mxu1 %v343_v30 }
  0x5e   : > { %1972 = vmatmul.mubr.msk.f32.gmra.mrb[38].mxu0 %vm780_vm0, %v289_v27 }
  0x5f   : > { %1974 = vmatprep.mubr.msk.f32.mxu0 %vm780_vm0, %v290_v29 }
  0x60   : > { %1859 = vmatmul.mubr.f32.gmra.mrb[28].mxu1 %v344_v32 }
  0x61   : > { %1861 = vmatprep.mubr.f32.mxu1 %v345_v34 }
  0x62   : > { %1975 = vmatmul.mubr.msk.f32.gmra.mrb[40].mxu0 %vm780_vm0, %v291_v31 }
  0x63   : > { %1977 = vmatprep.mubr.msk.f32.mxu0 %vm780_vm0, %v292_v33 }
  0x64   : > { %1862 = vmatmul.mubr.f32.gmra.mrb[30].mxu1 %v346_v36 }
  0x65   : > { %1864 = vmatprep.mubr.f32.mxu1 %v347_v38 }
  0x66   : > { %1978 = vmatmul.mubr.msk.f32.gmra.mrb[42].mxu0 %vm780_vm0, %v293_v35 }
  0x67   : > { %1980 = vmatprep.mubr.msk.f32.mxu0 %vm780_vm0, %v294_v37 }
  0x68   : > { %1865 = vmatmul.mubr.f32.gmra.mrb[32].mxu1 %v348_v40 }
  0x69   : > { %1867 = vmatprep.mubr.f32.mxu1 %v349_v42 }
  0x6a   : > { %1981 = vmatmul.mubr.msk.f32.gmra.mrb[44].mxu0 %vm780_vm0, %v295_v39  ;;  %v2422_v39 = vld [vmem:[%s2689_s4] ss:$0 sm:$0xff] }
  0x6b   : > { %1983 = vmatprep.mubr.msk.f32.mxu0 %vm780_vm0, %v296_v41 }
  0x6c   : > { %1868 = vmatmul.mubr.f32.gmra.mrb[34].mxu1 %v350_v44 }
  0x6d   : > { %1870 = vmatprep.mubr.f32.mxu1 %v351_v46 }
  0x6e   : > { %1984 = vmatmul.mubr.msk.f32.gmra.mrb[46].mxu0 %vm780_vm0, %v297_v43 }
  0x6f   : > { %1986 = vmatprep.mubr.msk.f32.mxu0 %vm780_vm0, %v298_v45 }
  0x70   : > { %1871 = vmatmul.mubr.f32.gmra.mrb[36].mxu1 %v352_v48 }
  0x71   : > { %1873 = vmatprep.mubr.f32.mxu1 %v353_v50 }
  0x72   : > { %1987 = vmatmul.mubr.msk.f32.gmra.mrb[48].mxu0 %vm780_vm0, %v299_v47 }
  0x73   : > { %1989 = vmatprep.mubr.msk.f32.mxu0 %vm780_vm0, %v300_v49 }
  0x74   : > { %1874 = vmatmul.mubr.f32.gmra.mrb[38].mxu1 %v354_v52 }
  0x75   : > { %1876 = vmatprep.mubr.f32.mxu1 %v355_v54 }
  0x76   : > { %1990 = vmatmul.mubr.msk.f32.gmra.mrb[50].mxu0 %vm780_vm0, %v301_v51 }
  0x77   : > { %1992 = vmatprep.mubr.msk.f32.mxu0 %vm780_vm0, %v302_v53 }
  0x78   : > { %1877 = vmatmul.mubr.f32.gmra.mrb[40].mxu1 %v356_v56 }
  0x79   : > { %1879 = vmatprep.mubr.f32.mxu1 %v357_v58 }
  0x7a   : > { %1993 = vmatmul.mubr.msk.f32.gmra.mrb[52].mxu0 %vm780_vm0, %v303_v55 }
  0x7b   : > { %1995 = vmatprep.mubr.msk.f32.mxu0 %vm780_vm0, %v304_v57 }
  0x7c   : > { %1880 = vmatmul.mubr.f32.gmra.mrb[42].mxu1 %v358_v60 }
  0x7d   : > { %1882 = vmatprep.mubr.f32.mxu1 %v359_v62 }
  0x7e   : > { %1996 = vmatmul.mubr.msk.f32.gmra.mrb[54].mxu0 %vm780_vm0, %v305_v59 }
  0x7f   : > { %1998 = vmatprep.mubr.msk.f32.mxu0 %vm780_vm0, %v306_v61 }
  0x80   : > { %1883 = vmatmul.mubr.f32.gmra.mrb[44].mxu1 %v360_v0 }
  0x81   : > { %1885 = vmatprep.mubr.f32.mxu1 %v361_v2 }
  0x82   : > { %1999 = vmatmul.mubr.msk.f32.gmra.mrb[56].mxu0 %vm780_vm0, %v307_v63 }
  0x83   : > { %2001 = vmatprep.mubr.msk.f32.mxu0 %vm780_vm0, %v308_v1 }
  0x84   : > { %1886 = vmatmul.mubr.f32.gmra.mrb[46].mxu1 %v362_v4 }
  0x85   : > { %1888 = vmatprep.mubr.f32.mxu1 %v363_v6 }
  0x86   : > { %2002 = vmatmul.mubr.msk.f32.gmra.mrb[58].mxu0 %vm780_vm0, %v309_v3 }
  0x87   : > { %2004 = vmatprep.mubr.msk.f32.mxu0 %vm780_vm0, %v310_v5 }
  0x88   : > { %1889 = vmatmul.mubr.f32.gmra.mrb[48].mxu1 %v364_v8 }
  0x89   : > { %1891 = vmatprep.mubr.f32.mxu1 %v365_v10 }
  0x8a   : > { %2005 = vmatmul.mubr.msk.f32.gmra.mrb[60].mxu0 %vm780_vm0, %v311_v7 }
  0x8b   : > { %2007 = vmatprep.mubr.msk.f32.mxu0 %vm780_vm0, %v312_v9 }
  0x8c   : > { %1892 = vmatmul.mubr.f32.gmra.mrb[50].mxu1 %v366_v12 }
  0x8d   : > { %1894 = vmatprep.mubr.f32.mxu1 %v367_v13 }
  0x8e   : > { %2008 = vmatmul.mubr.msk.f32.gmra.mrb[62].mxu0 %vm780_vm0, %v313_v11 }
  0x90   : > { %1895 = vmatmul.mubr.f32.gmra.mrb[52].mxu1 %v368_v14 }
  0x91   : > { %1897 = vmatprep.mubr.f32.mxu1 %v369_v15 }
  0x94   : > { %1898 = vmatmul.mubr.f32.gmra.mrb[54].mxu1 %v370_v16 }
  0x95   : > { %1900 = vmatprep.mubr.f32.mxu1 %v371_v17 }
  0x98   : > { %1901 = vmatmul.mubr.f32.gmra.mrb[56].mxu1 %v372_v18 }
  0x99   : > { %1903 = vmatprep.mubr.f32.mxu1 %v373_v19 }
  0x9c   : > { %1904 = vmatmul.mubr.f32.gmra.mrb[58].mxu1 %v374_v20 }
  0x9d   : > { %1906 = vmatprep.mubr.f32.mxu1 %v375_v21 }
  0xa0   : > { %1907 = vmatmul.mubr.f32.gmra.mrb[60].mxu1 %v376_v22 }
  0xa1   : > { %1909 = vmatprep.mubr.f32.mxu1 %v377_v23 }
  0xa4   : > { %1910 = vmatmul.mubr.f32.gmra.mrb[62].mxu1 %v378_v24 }
  0xe5   : > { %v1916_v25 = vpop.f32.mrb[0].mxu0 }
  0xe6   : > { %v1039_v26 = vpop.f32.mrb[1].mxu0 }
  0xe9   : > { %v1919_v27 = vpop.f32.mrb[2].mxu0 }
  0xea   : > { %v1049_v28 = vpop.f32.mrb[3].mxu0 }
  0xed   : > { %v1922_v29 = vpop.f32.mrb[4].mxu0 }
  0xee   : > { %v1059_v30 = vpop.f32.mrb[5].mxu0 }
  0xf1   : > { %v1925_v31 = vpop.f32.mrb[6].mxu0 }
  0xf2   : > { %v1069_v32 = vpop.f32.mrb[7].mxu0 }
  0xf5   : > { %v1928_v33 = vpop.f32.mrb[8].mxu0 }
  0xf6   : > { %v1079_v34 = vpop.f32.mrb[9].mxu0 }
  0xf9   : > { %v1931_v35 = vpop.f32.mrb[10].mxu0 }
  0xfa   : > { %v1089_v36 = vpop.f32.mrb[11].mxu0 }
  0xfb   : > { %v1818_v38 = vpop.f32.mrb[0].mxu1 }
  0xfc   : > { %v1045_v41 = vadd.f32 %v1916_v25, %v1818_v38  ;;  %v461_v42 = vpop.f32.mrb[1].mxu1 }
  0xfd   : > { %v2417_v37 = vpop.f32.mrb[12].mxu0  ;;  %v1040_v43 = vadd.f32 %v1039_v26, %v461_v42 }
  0xfe   : > { %v2424_v40 = vpop.f32.mrb[13].mxu0  ;;  %v1366_v44 = vadd.f32 %v2422_v39, %v1045_v41 }
  0xff   : > { %v1365_v46 = vadd.f32 %v2422_v39, %v1040_v43  ;;  %v1821_v47 = vpop.f32.mrb[2].mxu1 }
 0x100   : > { %1430 = vst [vmem:[%s2430_s19 + $0x8] sm:$0xff] %v1366_v44  ;;  %v1055_v49 = vadd.f32 %v1919_v27, %v1821_v47  ;;  %v471_v50 = vpop.f32.mrb[3].mxu1 }
 0x101   : > { %v2433_v45 = vpop.f32.mrb[14].mxu0  ;;  %1429 = vst [vmem:[%s2430_s19] sm:$0xff] %v1365_v46  ;;  %v1050_v51 = vadd.f32 %v1049_v28, %v471_v50 }
 0x102   : > { %v2436_v48 = vpop.f32.mrb[15].mxu0  ;;  %v1368_v52 = vadd.f32 %v2422_v39, %v1055_v49 }
 0x103   : > { %v1367_v54 = vadd.f32 %v2422_v39, %v1050_v51  ;;  %v1824_v55 = vpop.f32.mrb[4].mxu1 }
 0x104   : > { %1432 = vst [vmem:[%s2430_s19 + $0x18] sm:$0xff] %v1368_v52  ;;  %v1065_v57 = vadd.f32 %v1922_v29, %v1824_v55  ;;  %v481_v58 = vpop.f32.mrb[5].mxu1 }
 0x105   : > { %v2441_v53 = vpop.f32.mrb[16].mxu0  ;;  %1431 = vst [vmem:[%s2430_s19 + $0x10] sm:$0xff] %v1367_v54  ;;  %v1060_v59 = vadd.f32 %v1059_v30, %v481_v58 }
 0x106   : > { %v2444_v56 = vpop.f32.mrb[17].mxu0  ;;  %v1370_v60 = vadd.f32 %v2422_v39, %v1065_v57 }
 0x107   : > { %v1369_v62 = vadd.f32 %v2422_v39, %v1060_v59  ;;  %v1827_v63 = vpop.f32.mrb[6].mxu1 }
 0x108   : > { %1434 = vst [vmem:[%s2430_s19 + $0x28] sm:$0xff] %v1370_v60  ;;  %v1075_v1 = vadd.f32 %v1925_v31, %v1827_v63  ;;  %v491_v2 = vpop.f32.mrb[7].mxu1 }
 0x109   : > { %v2449_v61 = vpop.f32.mrb[18].mxu0  ;;  %1433 = vst [vmem:[%s2430_s19 + $0x20] sm:$0xff] %v1369_v62  ;;  %v1070_v3 = vadd.f32 %v1069_v32, %v491_v2 }
 0x10a   : > { %v2452_v0 = vpop.f32.mrb[19].mxu0  ;;  %v1372_v4 = vadd.f32 %v2422_v39, %v1075_v1 }
 0x10b   : > { %v1371_v6 = vadd.f32 %v2422_v39, %v1070_v3  ;;  %v1830_v7 = vpop.f32.mrb[8].mxu1 }
 0x10c   : > { %1436 = vst [vmem:[%s2430_s19 + $0x38] sm:$0xff] %v1372_v4  ;;  %v1085_v9 = vadd.f32 %v1928_v33, %v1830_v7  ;;  %v501_v10 = vpop.f32.mrb[9].mxu1 }
 0x10d   : > { %v2457_v5 = vpop.f32.mrb[20].mxu0  ;;  %1435 = vst [vmem:[%s2430_s19 + $0x30] sm:$0xff] %v1371_v6  ;;  %v1080_v11 = vadd.f32 %v1079_v34, %v501_v10 }
 0x10e   : > { %v2460_v8 = vpop.f32.mrb[21].mxu0  ;;  %v1374_v12 = vadd.f32 %v2422_v39, %v1085_v9 }
 0x10f   : > { %v1373_v14 = vadd.f32 %v2422_v39, %v1080_v11  ;;  %v1833_v15 = vpop.f32.mrb[10].mxu1 }
 0x110   : > { %1438 = vst [vmem:[%s2430_s19 + $0x48] sm:$0xff] %v1374_v12  ;;  %v1095_v17 = vadd.f32 %v1931_v35, %v1833_v15  ;;  %v511_v18 = vpop.f32.mrb[11].mxu1 }
 0x111   : > { %v2465_v13 = vpop.f32.mrb[22].mxu0  ;;  %1437 = vst [vmem:[%s2430_s19 + $0x40] sm:$0xff] %v1373_v14  ;;  %v1090_v19 = vadd.f32 %v1089_v36, %v511_v18 }
 0x112   : > { %v2468_v16 = vpop.f32.mrb[23].mxu0  ;;  %v1376_v20 = vadd.f32 %v2422_v39, %v1095_v17 }
 0x113   : > { %v1375_v22 = vadd.f32 %v2422_v39, %v1090_v19  ;;  %v1836_v23 = vpop.f32.mrb[12].mxu1 }
 0x114   : > { %1440 = vst [vmem:[%s2430_s19 + $0x58] sm:$0xff] %v1376_v20  ;;  %v1105_v25 = vadd.f32 %v2417_v37, %v1836_v23  ;;  %v521_v26 = vpop.f32.mrb[13].mxu1 }
 0x115   : > { %v2473_v21 = vpop.f32.mrb[24].mxu0  ;;  %1439 = vst [vmem:[%s2430_s19 + $0x50] sm:$0xff] %v1375_v22  ;;  %v1100_v27 = vadd.f32 %v2424_v40, %v521_v26 }
 0x116   : > { %v2476_v24 = vpop.f32.mrb[25].mxu0  ;;  %v1378_v28 = vadd.f32 %v2422_v39, %v1105_v25 }
 0x117   : > { %v1377_v30 = vadd.f32 %v2422_v39, %v1100_v27  ;;  %v1839_v31 = vpop.f32.mrb[14].mxu1 }
 0x118   : > { %1442 = vst [vmem:[%s2430_s19 + $0x68] sm:$0xff] %v1378_v28  ;;  %v1115_v33 = vadd.f32 %v2433_v45, %v1839_v31  ;;  %v531_v34 = vpop.f32.mrb[15].mxu1 }
 0x119   : > { %v2483_v29 = vpop.f32.mrb[26].mxu0  ;;  %1441 = vst [vmem:[%s2430_s19 + $0x60] sm:$0xff] %v1377_v30  ;;  %v1110_v35 = vadd.f32 %v2436_v48, %v531_v34 }
 0x11a   : > { %v2486_v32 = vpop.f32.mrb[27].mxu0  ;;  %v1380_v36 = vadd.f32 %v2422_v39, %v1115_v33 }
 0x11b   : > { %v1379_v38 = vadd.f32 %v2422_v39, %v1110_v35  ;;  %v1842_v40 = vpop.f32.mrb[16].mxu1 }
 0x11c   : > { %1444 = vst [vmem:[%s2430_s19 + $0x78] sm:$0xff] %v1380_v36  ;;  %v1125_v42 = vadd.f32 %v2441_v53, %v1842_v40  ;;  %v541_v43 = vpop.f32.mrb[17].mxu1 }
 0x11d   : > { %v2493_v37 = vpop.f32.mrb[28].mxu0  ;;  %1443 = vst [vmem:[%s2430_s19 + $0x70] sm:$0xff] %v1379_v38  ;;  %v1120_v44 = vadd.f32 %v2444_v56, %v541_v43 }
 0x11e   : > { %v2496_v41 = vpop.f32.mrb[29].mxu0  ;;  %v1382_v45 = vadd.f32 %v2422_v39, %v1125_v42 }
 0x11f   : > { %v1381_v47 = vadd.f32 %v2422_v39, %v1120_v44  ;;  %v1845_v48 = vpop.f32.mrb[18].mxu1 }
 0x120   : > { %1446 = vst [vmem:[%s2430_s19 + $0x88] sm:$0xff] %v1382_v45  ;;  %v1135_v50 = vadd.f32 %v2449_v61, %v1845_v48  ;;  %v551_v51 = vpop.f32.mrb[19].mxu1 }
 0x121   : > { %v2503_v46 = vpop.f32.mrb[30].mxu0  ;;  %1445 = vst [vmem:[%s2430_s19 + $0x80] sm:$0xff] %v1381_v47  ;;  %v1130_v52 = vadd.f32 %v2452_v0, %v551_v51 }
 0x122   : > { %v2506_v49 = vpop.f32.mrb[31].mxu0  ;;  %v1384_v53 = vadd.f32 %v2422_v39, %v1135_v50 }
 0x123   : > { %v1383_v55 = vadd.f32 %v2422_v39, %v1130_v52  ;;  %v1848_v56 = vpop.f32.mrb[20].mxu1 }
 0x124   : > { %1448 = vst [vmem:[%s2430_s19 + $0x98] sm:$0xff] %v1384_v53  ;;  %v1145_v58 = vadd.f32 %v2457_v5, %v1848_v56  ;;  %v561_v59 = vpop.f32.mrb[21].mxu1 }
 0x125   : > { %v2513_v54 = vpop.f32.mrb[32].mxu0  ;;  %1447 = vst [vmem:[%s2430_s19 + $0x90] sm:$0xff] %v1383_v55  ;;  %v1140_v60 = vadd.f32 %v2460_v8, %v561_v59 }
 0x126   : > { %v2516_v57 = vpop.f32.mrb[33].mxu0  ;;  %v1386_v61 = vadd.f32 %v2422_v39, %v1145_v58 }
 0x127   : > { %v1385_v63 = vadd.f32 %v2422_v39, %v1140_v60  ;;  %v1851_v0 = vpop.f32.mrb[22].mxu1 }
 0x128   : > { %1450 = vst [vmem:[%s2430_s19 + $0xa8] sm:$0xff] %v1386_v61  ;;  %v1155_v2 = vadd.f32 %v2465_v13, %v1851_v0  ;;  %v571_v3 = vpop.f32.mrb[23].mxu1 }
 0x129   : > { %v2523_v62 = vpop.f32.mrb[34].mxu0  ;;  %1449 = vst [vmem:[%s2430_s19 + $0xa0] sm:$0xff] %v1385_v63  ;;  %v1150_v4 = vadd.f32 %v2468_v16, %v571_v3 }
 0x12a   : > { %v2526_v1 = vpop.f32.mrb[35].mxu0  ;;  %v1388_v5 = vadd.f32 %v2422_v39, %v1155_v2 }
 0x12b   : > { %v1387_v7 = vadd.f32 %v2422_v39, %v1150_v4  ;;  %v1854_v8 = vpop.f32.mrb[24].mxu1 }
 0x12c   : > { %1452 = vst [vmem:[%s2430_s19 + $0xb8] sm:$0xff] %v1388_v5  ;;  %v1165_v10 = vadd.f32 %v2473_v21, %v1854_v8  ;;  %v581_v11 = vpop.f32.mrb[25].mxu1 }
 0x12d   : > { %v2533_v6 = vpop.f32.mrb[36].mxu0  ;;  %1451 = vst [vmem:[%s2430_s19 + $0xb0] sm:$0xff] %v1387_v7  ;;  %v1160_v12 = vadd.f32 %v2476_v24, %v581_v11 }
 0x12e   : > { %v2536_v9 = vpop.f32.mrb[37].mxu0  ;;  %v1390_v13 = vadd.f32 %v2422_v39, %v1165_v10 }
 0x12f   : > { %v1389_v15 = vadd.f32 %v2422_v39, %v1160_v12  ;;  %v1857_v16 = vpop.f32.mrb[26].mxu1 }
 0x130   : > { %1454 = vst [vmem:[%s2430_s19 + $0xc8] sm:$0xff] %v1390_v13  ;;  %v1175_v18 = vadd.f32 %v2483_v29, %v1857_v16  ;;  %v591_v19 = vpop.f32.mrb[27].mxu1 }
 0x131   : > { %v2543_v14 = vpop.f32.mrb[38].mxu0  ;;  %1453 = vst [vmem:[%s2430_s19 + $0xc0] sm:$0xff] %v1389_v15  ;;  %v1170_v20 = vadd.f32 %v2486_v32, %v591_v19 }
 0x132   : > { %v2546_v17 = vpop.f32.mrb[39].mxu0  ;;  %v1392_v21 = vadd.f32 %v2422_v39, %v1175_v18 }
 0x133   : > { %v1391_v23 = vadd.f32 %v2422_v39, %v1170_v20  ;;  %v1860_v24 = vpop.f32.mrb[28].mxu1 }
 0x134   : > { %1456 = vst [vmem:[%s2430_s19 + $0xd8] sm:$0xff] %v1392_v21  ;;  %v1185_v26 = vadd.f32 %v2493_v37, %v1860_v24  ;;  %v601_v27 = vpop.f32.mrb[29].mxu1 }
 0x135   : > { %v2553_v22 = vpop.f32.mrb[40].mxu0  ;;  %1455 = vst [vmem:[%s2430_s19 + $0xd0] sm:$0xff] %v1391_v23  ;;  %v1180_v28 = vadd.f32 %v2496_v41, %v601_v27 }
 0x136   : > { %v2556_v25 = vpop.f32.mrb[41].mxu0  ;;  %v1394_v29 = vadd.f32 %v2422_v39, %v1185_v26 }
 0x137   : > { %v1393_v31 = vadd.f32 %v2422_v39, %v1180_v28  ;;  %v1863_v32 = vpop.f32.mrb[30].mxu1 }
 0x138   : > { %1458 = vst [vmem:[%s2430_s19 + $0xe8] sm:$0xff] %v1394_v29  ;;  %v1195_v34 = vadd.f32 %v2503_v46, %v1863_v32  ;;  %v611_v35 = vpop.f32.mrb[31].mxu1 }
 0x139   : > { %v2563_v30 = vpop.f32.mrb[42].mxu0  ;;  %1457 = vst [vmem:[%s2430_s19 + $0xe0] sm:$0xff] %v1393_v31  ;;  %v1190_v36 = vadd.f32 %v2506_v49, %v611_v35 }
 0x13a   : > { %v2566_v33 = vpop.f32.mrb[43].mxu0  ;;  %v1396_v37 = vadd.f32 %v2422_v39, %v1195_v34 }
 0x13b   : > { %v1395_v40 = vadd.f32 %v2422_v39, %v1190_v36  ;;  %v1866_v41 = vpop.f32.mrb[32].mxu1 }
 0x13c   : > { %1460 = vst [vmem:[%s2430_s19 + $0xf8] sm:$0xff] %v1396_v37  ;;  %v1205_v43 = vadd.f32 %v2513_v54, %v1866_v41  ;;  %v621_v44 = vpop.f32.mrb[33].mxu1 }
 0x13d   : > { %v2573_v38 = vpop.f32.mrb[44].mxu0  ;;  %1459 = vst [vmem:[%s2430_s19 + $0xf0] sm:$0xff] %v1395_v40  ;;  %v1200_v45 = vadd.f32 %v2516_v57, %v621_v44 }
 0x13e   : > { %v2576_v42 = vpop.f32.mrb[45].mxu0  ;;  %v1398_v46 = vadd.f32 %v2422_v39, %v1205_v43 }
 0x13f   : > { %v1397_v48 = vadd.f32 %v2422_v39, %v1200_v45  ;;  %v1869_v49 = vpop.f32.mrb[34].mxu1 }
 0x140   : > { %1462 = vst [vmem:[%s2430_s19 + $0x108] sm:$0xff] %v1398_v46  ;;  %v1215_v51 = vadd.f32 %v2523_v62, %v1869_v49  ;;  %v631_v52 = vpop.f32.mrb[35].mxu1 }
 0x141   : > { %v2583_v47 = vpop.f32.mrb[46].mxu0  ;;  %1461 = vst [vmem:[%s2430_s19 + $0x100] sm:$0xff] %v1397_v48  ;;  %v1210_v53 = vadd.f32 %v2526_v1, %v631_v52 }
 0x142   : > { %v2586_v50 = vpop.f32.mrb[47].mxu0  ;;  %v1400_v54 = vadd.f32 %v2422_v39, %v1215_v51 }
 0x143   : > { %v1399_v56 = vadd.f32 %v2422_v39, %v1210_v53  ;;  %v1872_v57 = vpop.f32.mrb[36].mxu1 }
 0x144   : > { %1464 = vst [vmem:[%s2430_s19 + $0x118] sm:$0xff] %v1400_v54  ;;  %v1225_v59 = vadd.f32 %v2533_v6, %v1872_v57  ;;  %v641_v60 = vpop.f32.mrb[37].mxu1 }
 0x145   : > { %v2593_v55 = vpop.f32.mrb[48].mxu0  ;;  %1463 = vst [vmem:[%s2430_s19 + $0x110] sm:$0xff] %v1399_v56  ;;  %v1220_v61 = vadd.f32 %v2536_v9, %v641_v60 }
 0x146   : > { %v2596_v58 = vpop.f32.mrb[49].mxu0  ;;  %v1402_v62 = vadd.f32 %v2422_v39, %v1225_v59 }
 0x147   : > { %v1401_v0 = vadd.f32 %v2422_v39, %v1220_v61  ;;  %v1875_v1 = vpop.f32.mrb[38].mxu1 }
 0x148   : > { %1466 = vst [vmem:[%s2430_s19 + $0x128] sm:$0xff] %v1402_v62  ;;  %v1235_v3 = vadd.f32 %v2543_v14, %v1875_v1  ;;  %v651_v4 = vpop.f32.mrb[39].mxu1 }
 0x149   : > { %v2603_v63 = vpop.f32.mrb[50].mxu0  ;;  %1465 = vst [vmem:[%s2430_s19 + $0x120] sm:$0xff] %v1401_v0  ;;  %v1230_v5 = vadd.f32 %v2546_v17, %v651_v4 }
 0x14a   : > { %v2606_v2 = vpop.f32.mrb[51].mxu0  ;;  %v1404_v6 = vadd.f32 %v2422_v39, %v1235_v3 }
 0x14b   : > { %v1403_v8 = vadd.f32 %v2422_v39, %v1230_v5  ;;  %v1878_v9 = vpop.f32.mrb[40].mxu1 }
 0x14c   : > { %1468 = vst [vmem:[%s2430_s19 + $0x138] sm:$0xff] %v1404_v6  ;;  %v1245_v11 = vadd.f32 %v2553_v22, %v1878_v9  ;;  %v661_v12 = vpop.f32.mrb[41].mxu1 }
 0x14d   : > { %v2613_v7 = vpop.f32.mrb[52].mxu0  ;;  %1467 = vst [vmem:[%s2430_s19 + $0x130] sm:$0xff] %v1403_v8  ;;  %v1240_v13 = vadd.f32 %v2556_v25, %v661_v12 }
 0x14e   : > { %v2616_v10 = vpop.f32.mrb[53].mxu0  ;;  %v1406_v14 = vadd.f32 %v2422_v39, %v1245_v11 }
 0x14f   : > { %v1405_v16 = vadd.f32 %v2422_v39, %v1240_v13  ;;  %v1881_v17 = vpop.f32.mrb[42].mxu1 }
 0x150   : > { %1470 = vst [vmem:[%s2430_s19 + $0x148] sm:$0xff] %v1406_v14  ;;  %v1255_v19 = vadd.f32 %v2563_v30, %v1881_v17  ;;  %v671_v20 = vpop.f32.mrb[43].mxu1 }
 0x151   : > { %v1997_v15 = vpop.f32.mrb[54].mxu0  ;;  %1469 = vst [vmem:[%s2430_s19 + $0x140] sm:$0xff] %v1405_v16  ;;  %v1250_v21 = vadd.f32 %v2566_v33, %v671_v20 }
 0x152   : > { %v1309_v18 = vpop.f32.mrb[55].mxu0  ;;  %v1408_v22 = vadd.f32 %v2422_v39, %v1255_v19 }
 0x153   : > { %v1407_v24 = vadd.f32 %v2422_v39, %v1250_v21  ;;  %v1884_v25 = vpop.f32.mrb[44].mxu1 }
 0x154   : > { %1472 = vst [vmem:[%s2430_s19 + $0x158] sm:$0xff] %v1408_v22  ;;  %v1265_v27 = vadd.f32 %v2573_v38, %v1884_v25  ;;  %v681_v28 = vpop.f32.mrb[45].mxu1 }
 0x155   : > { %v2000_v23 = vpop.f32.mrb[56].mxu0  ;;  %1471 = vst [vmem:[%s2430_s19 + $0x150] sm:$0xff] %v1407_v24  ;;  %v1260_v29 = vadd.f32 %v2576_v42, %v681_v28 }
 0x156   : > { %v1319_v26 = vpop.f32.mrb[57].mxu0  ;;  %v1410_v30 = vadd.f32 %v2422_v39, %v1265_v27 }
 0x157   : > { %v1409_v32 = vadd.f32 %v2422_v39, %v1260_v29  ;;  %v1887_v33 = vpop.f32.mrb[46].mxu1 }
 0x158   : > { %1474 = vst [vmem:[%s2430_s19 + $0x168] sm:$0xff] %v1410_v30  ;;  %v1275_v35 = vadd.f32 %v2583_v47, %v1887_v33  ;;  %v691_v36 = vpop.f32.mrb[47].mxu1 }
 0x159   : > { %v2003_v31 = vpop.f32.mrb[58].mxu0  ;;  %1473 = vst [vmem:[%s2430_s19 + $0x160] sm:$0xff] %v1409_v32  ;;  %v1270_v37 = vadd.f32 %v2586_v50, %v691_v36 }
 0x15a   : > { %v1329_v34 = vpop.f32.mrb[59].mxu0  ;;  %v1412_v38 = vadd.f32 %v2422_v39, %v1275_v35 }
 0x15b   : > { %v1411_v41 = vadd.f32 %v2422_v39, %v1270_v37  ;;  %v1890_v42 = vpop.f32.mrb[48].mxu1 }
 0x15c   : > { %1476 = vst [vmem:[%s2430_s19 + $0x178] sm:$0xff] %v1412_v38  ;;  %v1285_v44 = vadd.f32 %v2593_v55, %v1890_v42  ;;  %v701_v45 = vpop.f32.mrb[49].mxu1 }
 0x15d   : > { %v2006_v40 = vpop.f32.mrb[60].mxu0  ;;  %1475 = vst [vmem:[%s2430_s19 + $0x170] sm:$0xff] %v1411_v41  ;;  %v1280_v46 = vadd.f32 %v2596_v58, %v701_v45 }
 0x15e   : > { %v1339_v43 = vpop.f32.mrb[61].mxu0  ;;  %v1414_v47 = vadd.f32 %v2422_v39, %v1285_v44 }
 0x15f   : > { %v1413_v49 = vadd.f32 %v2422_v39, %v1280_v46  ;;  %v1893_v50 = vpop.f32.mrb[50].mxu1 }
 0x160   : > { %1478 = vst [vmem:[%s2430_s19 + $0x188] sm:$0xff] %v1414_v47  ;;  %v1295_v52 = vadd.f32 %v2603_v63, %v1893_v50  ;;  %v711_v53 = vpop.f32.mrb[51].mxu1 }
 0x161   : > { %v2009_v48 = vpop.f32.mrb[62].mxu0  ;;  %1477 = vst [vmem:[%s2430_s19 + $0x180] sm:$0xff] %v1413_v49  ;;  %v1290_v54 = vadd.f32 %v2606_v2, %v711_v53 }
 0x162   : > { %v1349_v51 = vpop.f32.mrb[63].mxu0  ;;  %v1416_v55 = vadd.f32 %v2422_v39, %v1295_v52 }
 0x163   : > { %v1415_v56 = vadd.f32 %v2422_v39, %v1290_v54  ;;  %v1896_v57 = vpop.f32.mrb[52].mxu1 }
 0x164   : > { %1480 = vst [vmem:[%s2430_s19 + $0x198] sm:$0xff] %v1416_v55  ;;  %v1305_v58 = vadd.f32 %v2613_v7, %v1896_v57  ;;  %v721_v59 = vpop.f32.mrb[53].mxu1 }
 0x165   : > { %1479 = vst [vmem:[%s2430_s19 + $0x190] sm:$0xff] %v1415_v56  ;;  %v1300_v60 = vadd.f32 %v2616_v10, %v721_v59 }
 0x166   : > { %v1418_v61 = vadd.f32 %v2422_v39, %v1305_v58 }
 0x167   : > { %v1417_v62 = vadd.f32 %v2422_v39, %v1300_v60  ;;  %v1899_v63 = vpop.f32.mrb[54].mxu1 }
 0x168   : > { %1482 = vst [vmem:[%s2430_s19 + $0x1a8] sm:$0xff] %v1418_v61  ;;  %v1315_v0 = vadd.f32 %v1997_v15, %v1899_v63  ;;  %v731_v1 = vpop.f32.mrb[55].mxu1 }
 0x169   : > { %1481 = vst [vmem:[%s2430_s19 + $0x1a0] sm:$0xff] %v1417_v62  ;;  %v1310_v2 = vadd.f32 %v1309_v18, %v731_v1 }
 0x16a   : > { %v1420_v3 = vadd.f32 %v2422_v39, %v1315_v0 }
 0x16b   : > { %v1419_v4 = vadd.f32 %v2422_v39, %v1310_v2  ;;  %v1902_v5 = vpop.f32.mrb[56].mxu1 }
 0x16c   : > { %1484 = vst [vmem:[%s2430_s19 + $0x1b8] sm:$0xff] %v1420_v3  ;;  %v1325_v6 = vadd.f32 %v2000_v23, %v1902_v5  ;;  %v741_v7 = vpop.f32.mrb[57].mxu1 }
 0x16d   : > { %1483 = vst [vmem:[%s2430_s19 + $0x1b0] sm:$0xff] %v1419_v4  ;;  %v1320_v8 = vadd.f32 %v1319_v26, %v741_v7 }
 0x16e   : > { %v1422_v9 = vadd.f32 %v2422_v39, %v1325_v6 }
 0x16f   : > { %v1421_v10 = vadd.f32 %v2422_v39, %v1320_v8  ;;  %v1905_v11 = vpop.f32.mrb[58].mxu1 }
 0x170   : > { %1486 = vst [vmem:[%s2430_s19 + $0x1c8] sm:$0xff] %v1422_v9  ;;  %v1335_v12 = vadd.f32 %v2003_v31, %v1905_v11  ;;  %v751_v13 = vpop.f32.mrb[59].mxu1 }
 0x171   : > { %1485 = vst [vmem:[%s2430_s19 + $0x1c0] sm:$0xff] %v1421_v10  ;;  %v1330_v14 = vadd.f32 %v1329_v34, %v751_v13 }
 0x172   : > { %v1424_v15 = vadd.f32 %v2422_v39, %v1335_v12 }
 0x173   : > { %v1423_v16 = vadd.f32 %v2422_v39, %v1330_v14  ;;  %v1908_v17 = vpop.f32.mrb[60].mxu1 }
 0x174   : > { %1488 = vst [vmem:[%s2430_s19 + $0x1d8] sm:$0xff] %v1424_v15  ;;  %v1345_v18 = vadd.f32 %v2006_v40, %v1908_v17  ;;  %v761_v19 = vpop.f32.mrb[61].mxu1 }
 0x175   : > { %1487 = vst [vmem:[%s2430_s19 + $0x1d0] sm:$0xff] %v1423_v16  ;;  %v1340_v20 = vadd.f32 %v1339_v43, %v761_v19 }
 0x176   : > { %v1426_v21 = vadd.f32 %v2422_v39, %v1345_v18 }
 0x177   : > { %v1425_v22 = vadd.f32 %v2422_v39, %v1340_v20  ;;  %v1911_v23 = vpop.f32.mrb[62].mxu1 }
 0x178   : > { %1490 = vst [vmem:[%s2430_s19 + $0x1e8] sm:$0xff] %v1426_v21  ;;  %v1355_v24 = vadd.f32 %v2009_v48, %v1911_v23  ;;  %v771_v25 = vpop.f32.mrb[63].mxu1 }
 0x179   : > { %1489 = vst [vmem:[%s2430_s19 + $0x1e0] sm:$0xff] %v1425_v22  ;;  %v1350_v26 = vadd.f32 %v1349_v51, %v771_v25 }
 0x17a   : > { %v1428_v27 = vadd.f32 %v2422_v39, %v1355_v24 }
 0x17b   : > { %v1427_v28 = vadd.f32 %v2422_v39, %v1350_v26 }
 0x17c   : > { %1492 = vst [vmem:[%s2430_s19 + $0x1f8] sm:$0xff] %v1428_v27 }
 0x17d   : > { %1491 = vst [vmem:[%s2430_s19 + $0x1f0] sm:$0xff] %v1427_v28 }
 0x17e PF: > { %s15_s18 = sadd.s32 1, %s2120_s18  }
 0x17f   : > { %p12_p4 = scmp.ge.s32.totalorder %s15_s18, 4  }
 0x181   :  { %14 = sbr.rel (!%p12_p4) target bundleno = 1 (0x1), region = 73 }

</bundles_post_ra>
